<compile_context>
chip_gen: v7x
topology: tpu7x:2x2x1
jax: 0.10.0
libtpu: 0.0.40
codegen_flags: <defaults>
</compile_context>

<pallas_src>
import jax
import jax.numpy as jnp
from jax.experimental import pallas as pl
from jax.experimental.pallas import tpu as pltpu

# Static problem configuration (DummyUNet: nn.Conv2d(3, 6, 3, 1, padding=1)).
CIN, COUT_FULL, KH, KW = 3, 6, 3, 3
COUT = COUT_FULL // 2        # channels surviving chunk(2, dim=1)[0]
COUT_PAD = 8                 # pad to a full sublane tile -> unmasked stores
K_RAW = CIN * KH * KW + 1    # 27 taps + 1 ones-row for the folded-in bias
K_PAD = 32                   # pad contraction dim to a multiple of 8 sublanes


def _conv_matmul_kernel(w_ref, x_ref, o_ref):
    # w_ref: (COUT_PAD, K_PAD)  weights (bias folded in as a column, zero pad)
    # x_ref: (K_PAD, N*HW)      im2col patches for the whole batch, lane-dense
    # o_ref: (COUT_PAD, N*HW)   lane-dense output (N*HW = 512 lanes)
    o_ref[...] = jnp.dot(
        w_ref[...], x_ref[...], preferred_element_type=jnp.float32
    ).astype(o_ref.dtype)


def prepare_conv_weight(weight_oihw, bias):
    """One-time (per weight update) augmentation, kept OUT of the jitted
    per-call path: slice to the surviving output channels, fold bias in as an
    extra column, zero-pad to (COUT_PAD, K_PAD)."""
    w2d = weight_oihw[:COUT].reshape(COUT, CIN * KH * KW).astype(jnp.float32)
    b = bias[:COUT].astype(jnp.float32)
    w_aug = jnp.concatenate([w2d, b[:, None]], axis=1)            # (3, 28)
    w_aug = jnp.pad(w_aug, ((0, COUT_PAD - COUT), (0, K_PAD - K_RAW)))
    return w_aug                                                  # (8, 32)


def conv2d_same_take_half_pallas(x_nchw, w_aug):
    """conv2d(stride=1, padding='same') fused with chunk(2, dim=1)[0]."""
    N, Cin, H, W = x_nchw.shape
    assert Cin == CIN, x_nchw.shape
    HW = H * W
    pad = (KH - 1) // 2

    # ---- im2col in the wrapper (plain XLA; fuses around the custom call) ----
    x_pad = jnp.pad(
        x_nchw.astype(jnp.float32), ((0, 0), (0, 0), (pad, pad), (pad, pad)))
    taps = [x_pad[:, :, kh:kh + H, kw:kw + W]
            for kh in range(KH) for kw in range(KW)]
    patches = jnp.stack(taps, axis=2).reshape(N, CIN * KH * KW, HW)
    ones = jnp.ones((N, 1, HW), jnp.float32)                   # bias row
    zeros = jnp.zeros((N, K_PAD - K_RAW, HW), jnp.float32)     # tile padding
    patches = jnp.concatenate([patches, ones, zeros], axis=1)  # (N, K_PAD, HW)
    # Fold batch into the lane axis: (N, K_PAD, HW) -> (K_PAD, N*HW).
    patches = patches.transpose(1, 0, 2).reshape(K_PAD, N * HW)

    flops = 2 * COUT_PAD * K_PAD * N * HW
    bytes_accessed = 4 * (COUT_PAD * K_PAD + K_PAD * N * HW + COUT_PAD * N * HW)

    # ---- single Pallas invocation: one (8,32)x(32,N*HW) MXU matmul ----
    out = pl.pallas_call(
        _conv_matmul_kernel,
        out_shape=jax.ShapeDtypeStruct((COUT_PAD, N * HW), jnp.float32),
        in_specs=[pl.BlockSpec(memory_space=pltpu.MemorySpace.VMEM),
                  pl.BlockSpec(memory_space=pltpu.MemorySpace.VMEM)],
        out_specs=pl.BlockSpec(memory_space=pltpu.MemorySpace.VMEM),
        cost_estimate=pl.CostEstimate(
            flops=flops, transcendentals=0, bytes_accessed=bytes_accessed),
    )(w_aug, patches)

    # Undo padding / batch fold: (8, N*HW) -> slice [:3] -> (N, 3, H, W).
    out = out[:COUT].reshape(COUT, N, H, W).transpose(1, 0, 2, 3)
    return out.astype(x_nchw.dtype)


def dummy_unet_forward(x_nchw, t, c, w_aug):
    """Mirrors DummyUNet.forward: conv -> chunk(2, dim=1)[0] (the prediction)."""
    del t, c  # unused by DummyUNet.forward, kept for API parity
    return conv2d_same_take_half_pallas(x_nchw, w_aug)


if __name__ == "__main__":
    key = jax.random.PRNGKey(0)
    k_x, k_t, k_c, k_w, k_b = jax.random.split(key, 5)

    N, Cin, H, W = 2, 3, 16, 16
    Cout_full, KH_, KW_ = 6, 3, 3

    x = jax.random.normal(k_x, (N, Cin, H, W), dtype=jnp.float32)
    t = jax.random.randint(k_t, (N,), 0, 1000)              # unused, API parity
    c = jax.random.normal(k_c, (N, 8), dtype=jnp.float32)   # unused, API parity

    # Deterministic init, same shapes as nn.Conv2d(3, 6, 3, 1, padding=1)
    fan_in = Cin * KH_ * KW_
    bound = 1.0 / (fan_in ** 0.5)
    weight = jax.random.uniform(
        k_w, (Cout_full, Cin, KH_, KW_), minval=-bound, maxval=bound,
        dtype=jnp.float32)
    bias = jax.random.uniform(
        k_b, (Cout_full,), minval=-bound, maxval=bound, dtype=jnp.float32)

    # Weight augmentation done once, outside the jitted per-call path.
    w_aug = jax.block_until_ready(prepare_conv_weight(weight, bias))

    forward = jax.jit(dummy_unet_forward)
    pred = forward(x, t, c, w_aug)
    pred = jax.block_until_ready(pred)

    # Reference: full 6-channel conv (as the PyTorch module computes it), then
    # chunk(2, dim=1)[0].
    ref = jax.lax.conv_general_dilated(
        x, weight, window_strides=(1, 1), padding=((1, 1), (1, 1)),
        dimension_numbers=("NCHW", "OIHW", "NCHW"),
    ) + bias.reshape(1, Cout_full, 1, 1)
    ref_pred = ref[:, : Cout_full // 2]

    assert pred.shape == (N, Cout_full // 2, H, W), pred.shape
    max_err = float(jnp.max(jnp.abs(pred - ref_pred)))
    assert jnp.allclose(pred, ref_pred, atol=1e-5, rtol=1e-5), max_err
    print("KERNEL_OK")
</pallas_src>

<mosaic_0001>
module attributes {stable_mosaic.version = 11 : i64} {
  func.func @_conv_matmul_kernel(%arg0: memref<8x32xf32, #tpu.memory_space<vmem>>, %arg1: memref<32x512xf32, #tpu.memory_space<vmem>>, %arg2: memref<8x512xf32, #tpu.memory_space<vmem>>) attributes {dimension_semantics = [], scalar_prefetch = 0 : i64, scratch_operands = 0 : i64, tpu.core_type = #tpu.core_type<tc>} {
    %c0 = arith.constant 0 : index
    %c0_0 = arith.constant 0 : index
    %0 = vector.load %arg0[%c0, %c0_0] : memref<8x32xf32, #tpu.memory_space<vmem>>, vector<8x32xf32>
    %c0_1 = arith.constant 0 : index
    %c0_2 = arith.constant 0 : index
    %1 = vector.load %arg1[%c0_1, %c0_2] : memref<32x512xf32, #tpu.memory_space<vmem>>, vector<32x512xf32>
    %cst = arith.constant dense<0.000000e+00> : vector<8x512xf32>
    %2 = tpu.matmul %0, %1, %cst {dimension_numbers = #tpu.dot_dimension_numbers<[1], [0], [0], [1], [0, 0, 1, 1], [], []>} : vector<8x32xf32>, vector<32x512xf32>, vector<8x512xf32> -> vector<8x512xf32>
    %c0_3 = arith.constant 0 : index
    %c0_4 = arith.constant 0 : index
    %3 = vector.load %arg2[%c0_3, %c0_4] : memref<8x512xf32, #tpu.memory_space<vmem>>, vector<8x512xf32>
    tpu.vector_store %arg2[%c0_3, %c0_4], %2 {strides = array<i32>} : memref<8x512xf32, #tpu.memory_space<vmem>>, vector<8x512xf32>,
    return
  }
}

</mosaic_0001>

<bundles_post_ra>
// kernel: dummy_unet_forward.1
= control target key start
LH: loop header
LB: loop body
LE: loop exit
PB: predicated region body
PF: predicated region fallthrough
CT: control target
= control target key end

     0   :  { %v201_v3 = vmov 0.0   ;;  %vm28_vm0 = vcmask 261120   ;;  %s280_s1 = inlined_call_operand.vmem [shape: f32[32,512], index: 1, kind: input, shape index: {}]   ;;  %s281_s0 = inlined_call_operand.vmem [shape: f32[8,32], index: 0, kind: input, shape index: {}]   ;;  %s282_s2 = inlined_call_operand.vmem [shape: f32[8,512], index: 2, kind: output, shape index: {}]  }
   0x1   :  { %v13_v0 = vld [vmem:[%s280_s1 + $0x8] sm:$0xff]  ;;  %v15_v2 = vld [vmem:[%s280_s1 + $0x18] sm:$0xff]  ;;  %96 = vmatprep.mubr.f32.mxu0 %v201_v3  ;;  %167 = vmatprep.mubr.f32.mxu1 %v201_v3  ;;  %v12_v6 = vld [vmem:[%s280_s1] sm:$0xff] }
   0x2   :  { %v17_v1 = vld [vmem:[%s280_s1 + $0x28] sm:$0xff]  ;;  %v19_v5 = vld [vmem:[%s280_s1 + $0x38] sm:$0xff]  ;;  %v16_v7 = vld [vmem:[%s280_s1 + $0x20] sm:$0xff] }
   0x3   :  { %v184_v4 = vpack.c.bf16 %v17_v1, %v13_v0  ;;  %v192_v8 = vpack.c.bf16 %v19_v5, %v15_v2  ;;  %v186_v9 = vpack.c.bf16 %v16_v7, %v12_v6  ;;  %v14_v10 = vld [vmem:[%s280_s1 + $0x10] sm:$0xff]  ;;  %v21_v12 = vld [vmem:[%s280_s1 + $0x48] sm:$0xff]  ;;  %v23_v15 = vld [vmem:[%s280_s1 + $0x58] sm:$0xff] }
   0x4   :  { %v18_v11 = vld [vmem:[%s280_s1 + $0x30] sm:$0xff]  ;;  %v25_v14 = vld [vmem:[%s280_s1 + $0x68] sm:$0xff]  ;;  %v27_v16 = vld [vmem:[%s280_s1 + $0x78] sm:$0xff] }
   0x5   :  { %185 = vmatprep.subr.bf16.mxu0 %v184_v4  ;;  %v194_v13 = vpack.c.bf16 %v18_v11, %v14_v10  ;;  %193 = vmatprep.subr.bf16.mxu1 %v192_v8  ;;  %v188_v17 = vpack.c.bf16 %v25_v14, %v21_v12  ;;  %v196_v18 = vpack.c.bf16 %v27_v16, %v23_v15  ;;  %v20_v19 = vld [vmem:[%s280_s1 + $0x40] sm:$0xff]  ;;  %v22_v21 = vld [vmem:[%s280_s1 + $0x50] sm:$0xff] }
   0x6   :  { %187 = vmatpush1.bf16.msra.mxu0 %v186_v9  ;;  %v24_v20 = vld [vmem:[%s280_s1 + $0x60] sm:$0xff]  ;;  %v26_v23 = vld [vmem:[%s280_s1 + $0x70] sm:$0xff] }
   0x7   :  { %195 = vmatpush1.bf16.msra.mxu1 %v194_v13  ;;  %v190_v22 = vpack.c.bf16 %v24_v20, %v20_v19  ;;  %189 = vmatprep.subr.bf16.mxu0 %v188_v17  ;;  %v198_v24 = vpack.c.bf16 %v26_v23, %v22_v21  ;;  %v11_v25 = vld [vmem:[%s281_s0] sm:$0xff] }
   0x8   :  { %197 = vmatprep.subr.bf16.mxu1 %v196_v18 }
   0xa   :  { %191 = vmatpush1.bf16.msra.mxu0 %v190_v22 }
   0xb   :  { %199 = vmatpush1.bf16.msra.mxu1 %v198_v24 }
   0xd   :  { %182 = vmatmul.mubr.msk.f32.vlgmr.msra.gmra.mrb[0].mxu0 %vm28_vm0, %v11_v25 }
   0xe   :  { %183 = vmatmul.mubr.msk.f32.vlgmr.msra.gmra.mrb[0].mxu1 %vm28_vm0, %v11_v25 }
  0xe0   :  { %v98_v26 = vpop.f32.mrb[0].mxu0 }
  0xe1   :  { %174 = vst [vmem:[%s282_s2] sm:$0xff] %v98_v26  ;;  %v169_v27 = vpop.f32.mrb[0].mxu1  ;;  %v100_v28 = vpop.f32.mrb[1].mxu0 }
  0xe2   :  { %176 = vst [vmem:[%s282_s2 + $0x10] sm:$0xff] %v169_v27  ;;  %175 = vst [vmem:[%s282_s2 + $0x8] sm:$0xff] %v100_v28  ;;  %v171_v29 = vpop.f32.mrb[1].mxu1 }
  0xe3   :  { %177 = vst [vmem:[%s282_s2 + $0x18] sm:$0xff] %v171_v29 }

</bundles_post_ra>
